<compile_context>
chip_gen: v7x
topology: tpu7x:2x2x1
jax: 0.10.0
libtpu: 0.0.40
codegen_flags: <defaults>
</compile_context>

<pallas_src>
from functools import partial

import numpy as np
import jax
import jax.numpy as jnp
from jax.experimental import pallas as pl
from jax.experimental.pallas import tpu as pltpu


# ----------------------------------------------------------------------------
# Parameter construction (mirrors torchaudio defaults / formulas)
# ----------------------------------------------------------------------------
def _round_up(x, m):
    return ((x + m - 1) // m) * m


def _hz_to_mel_htk(f):
    return 2595.0 * np.log10(1.0 + f / 700.0)


def _mel_to_hz_htk(m):
    return 700.0 * (10.0 ** (m / 2595.0) - 1.0)


def _melscale_fbanks(n_freqs, f_min, f_max, n_mels, sample_rate):
    """HTK-scale triangular mel filterbank, norm=None (torchaudio.functional.melscale_fbanks)."""
    all_freqs = np.linspace(0.0, sample_rate // 2, n_freqs)
    m_pts = np.linspace(_hz_to_mel_htk(f_min), _hz_to_mel_htk(f_max), n_mels + 2)
    f_pts = _mel_to_hz_htk(m_pts)
    f_diff = f_pts[1:] - f_pts[:-1]                      # (n_mels + 1,)
    slopes = f_pts[None, :] - all_freqs[:, None]         # (n_freqs, n_mels + 2)
    down = (-slopes[:, :-2]) / f_diff[:-1]
    up = slopes[:, 2:] / f_diff[1:]
    return np.maximum(0.0, np.minimum(down, up)).astype(np.float32)   # (n_freqs, n_mels)


def _windowed_dft_basis(n_fft, win_length, n_freq_pad):
    """[cos | sin] windowed DFT basis, lane-padded: shape (n_fft, 2*n_freq_pad)."""
    n_freq = n_fft // 2 + 1
    n = np.arange(win_length)
    win = 0.5 * (1.0 - np.cos(2.0 * np.pi * n / win_length))    # periodic Hann
    w = np.zeros(n_fft)
    lpad = (n_fft - win_length) // 2
    w[lpad:lpad + win_length] = win
    k = np.arange(n_fft)[:, None]
    f = np.arange(n_freq)[None, :]
    ang = 2.0 * np.pi * k * f / n_fft
    basis = np.zeros((n_fft, 2 * n_freq_pad), np.float32)
    basis[:, :n_freq] = w[:, None] * np.cos(ang)
    basis[:, n_freq_pad:n_freq_pad + n_freq] = w[:, None] * np.sin(ang)
    return basis


# ----------------------------------------------------------------------------
# Pallas kernel: in-VMEM framing -> windowed DFT -> power -> mel -> log(.+1e-3)
# ----------------------------------------------------------------------------
def _mel_kernel(chunks_ref, extra_ref, basis_ref, fb_ref, out_ref, *,
                n_taps, frames_per_tile, n_freq_pad):
    # Rebuild overlapping frames from non-overlapping hop-sized chunks (all in VMEM).
    comb = jnp.concatenate([chunks_ref[...], extra_ref[...]], axis=0)
    frames = jnp.concatenate(
        [comb[j:j + frames_per_tile] for j in range(n_taps)], axis=1)   # (FT, n_fft)
    frames = frames.astype(jnp.bfloat16)

    # Single MXU pass producing [re | im] side by side (lane-padded to 2*n_freq_pad).
    spec = jnp.dot(frames, basis_ref[...], preferred_element_type=jnp.float32)
    re = spec[:, :n_freq_pad]
    im = spec[:, n_freq_pad:]
    power = re * re + im * im                                          # power = 2.0, f32

    mel = jnp.dot(power, fb_ref[...], preferred_element_type=jnp.float32)
    out_ref[...] = jnp.log(mel + 0.001)


def mel_spectrogram_fixed(x, *, sample_rate=16000, n_fft=128, hop_length=64,
                          win_length=None, n_mels=32, f_min=0.0, f_max=None,
                          frame_tile=512):
    """x: (B, T) float32 waveform -> (B, n_mels, n_frames - 1) float32 (torch layout)."""
    if win_length is None:
        win_length = n_fft
    if f_max is None:
        f_max = float(sample_rate) / 2.0
    if hop_length > n_fft or n_fft % hop_length != 0:
        # TODO(synk): hop_length not dividing n_fft needs a gather-based framing path.
        raise NotImplementedError("hop_length must divide n_fft")

    B, T = x.shape
    n_freq = n_fft // 2 + 1
    n_freq_pad = _round_up(n_freq, 128)
    pad = n_fft // 2
    r = n_fft // hop_length                       # hop-chunks per frame

    # center=True reflect padding; we only frame n_frames-1 rows (last frame dropped).
    xp = jnp.pad(x.astype(jnp.float32), ((0, 0), (pad, pad)), mode="reflect")
    n_frames = (xp.shape[1] - n_fft) // hop_length          # full frame count minus 1
    assert n_frames >= 1

    extra_rows = _round_up(max(r - 1, 1), 8)                # small aligned "next chunks" block
    ft = _round_up(min(frame_tile, _round_up(n_frames, extra_rows)), extra_rows)
    f_pad = _round_up(n_frames, ft)
    n_tiles = f_pad // ft
    total_rows = f_pad + extra_rows

    # Reshape padded waveform into non-overlapping hop-sized chunks (no duplication).
    need = total_rows * hop_length
    cur = xp.shape[1]
    if cur < need:
        xp = jnp.pad(xp, ((0, 0), (0, need - cur)))
    elif cur > need:
        xp = xp[:, :need]
    chunks = xp.reshape(B, total_rows, hop_length)

    basis = jnp.asarray(_windowed_dft_basis(n_fft, win_length, n_freq_pad),
                        dtype=jnp.bfloat16)
    fb_np = np.zeros((n_freq_pad, n_mels), np.float32)
    fb_np[:n_freq, :] = _melscale_fbanks(n_freq, f_min, f_max, n_mels, sample_rate)
    fb = jnp.asarray(fb_np)

    eb = ft // extra_rows     # "extra" block index stride (block size = extra_rows rows)
    kernel = partial(_mel_kernel, n_taps=r, frames_per_tile=ft, n_freq_pad=n_freq_pad)

    out = pl.pallas_call(
        kernel,
        out_shape=jax.ShapeDtypeStruct((B, f_pad, n_mels), jnp.float32),
        grid_spec=pltpu.PrefetchScalarGridSpec(
            num_scalar_prefetch=0,
            grid=(B, n_tiles),
            in_specs=[
                # main chunk tile for this (batch, frame-tile)
                pl.BlockSpec((None, ft, hop_length), lambda b, t: (b, t, 0)),
                # the few chunks right after the tile (needed for overlapping frames)
                pl.BlockSpec((None, extra_rows, hop_length),
                             lambda b, t: (b, (t + 1) * eb, 0)),
                # resident constants
                pl.BlockSpec((n_fft, 2 * n_freq_pad), lambda b, t: (0, 0)),
                pl.BlockSpec((n_freq_pad, n_mels), lambda b, t: (0, 0)),
            ],
            out_specs=pl.BlockSpec((None, ft, n_mels), lambda b, t: (b, t, 0)),
        ),
        compiler_params=pltpu.CompilerParams(
            dimension_semantics=("parallel", "parallel")),
    )(chunks, chunks, basis, fb)

    out = out[:, :n_frames, :]                 # drop padded tail frames
    return jnp.transpose(out, (0, 2, 1))       # (B, n_mels, n_frames-1), torch layout


if __name__ == "__main__":
    key = jax.random.PRNGKey(0)
    B, T = 2, 512
    sr, n_fft, hop, n_mels = 16000, 128, 64, 32
    x = jax.random.normal(key, (B, T), dtype=jnp.float32)

    y = mel_spectrogram_fixed(x, sample_rate=sr, n_fft=n_fft, hop_length=hop,
                              n_mels=n_mels)
    y = jax.block_until_ready(y)

    expected_frames = T // hop          # center-padded frame count minus dropped frame
    assert y.shape == (B, n_mels, expected_frames), y.shape
    assert y.dtype == jnp.float32
    assert bool(jnp.all(jnp.isfinite(y)))

    # Pure-JAX reference with identically bf16-quantized matmul operands.
    n_freq = n_fft // 2 + 1
    n_freq_pad = 128
    padr = n_fft // 2
    xr = jnp.pad(x, ((0, 0), (padr, padr)), mode="reflect")
    idx = np.arange(expected_frames)[:, None] * hop + np.arange(n_fft)[None, :]
    frames = xr[:, idx].astype(jnp.bfloat16).astype(jnp.float32)
    basis_q = jnp.asarray(_windowed_dft_basis(n_fft, n_fft, n_freq_pad),
                          jnp.bfloat16).astype(jnp.float32)
    spec = jnp.einsum("bfk,kn->bfn", frames, basis_q)
    power = spec[..., :n_freq_pad] ** 2 + spec[..., n_freq_pad:] ** 2
    fb_ref = np.zeros((n_freq_pad, n_mels), np.float32)
    fb_ref[:n_freq, :] = _melscale_fbanks(n_freq, 0.0, sr / 2.0, n_mels, sr)
    ref = jnp.log(jnp.einsum("bfn,nm->bfm", power, jnp.asarray(fb_ref)) + 0.001)
    ref = jnp.transpose(ref, (0, 2, 1))
    max_err = float(jnp.max(jnp.abs(ref - y)))
    assert max_err < 5e-2, max_err

    print("KERNEL_OK")
</pallas_src>

<mosaic_0001>
module attributes {stable_mosaic.version = 11 : i64} {
  func.func @_mel_kernel(%arg0: i32, %arg1: i32, %arg2: memref<1x8x64xf32, #tpu.memory_space<vmem>>, %arg3: memref<1x8x64xf32, #tpu.memory_space<vmem>>, %arg4: memref<128x256xbf16, #tpu.memory_space<vmem>>, %arg5: memref<128x32xf32, #tpu.memory_space<vmem>>, %arg6: memref<1x8x32xf32, #tpu.memory_space<vmem>>) attributes {dimension_semantics = [#tpu.dimension_semantics<parallel>, #tpu.dimension_semantics<parallel>], iteration_bounds = array<i64: 2, 1>, scalar_prefetch = 0 : i64, scratch_operands = 0 : i64, tpu.core_type = #tpu.core_type<tc>, window_params = [{transform_indices = @transform_0, window_bounds = array<i64: 1, 8, 64>}, {transform_indices = @transform_1, window_bounds = array<i64: 1, 8, 64>}, {pipeline_mode = #tpu.pipeline_mode<synchronous>, transform_indices = @transform_2, window_bounds = array<i64: 128, 256>}, {pipeline_mode = #tpu.pipeline_mode<synchronous>, transform_indices = @transform_3, window_bounds = array<i64: 128, 32>}, {transform_indices = @transform_4, window_bounds = array<i64: 1, 8, 32>}]} {
    %c0 = arith.constant 0 : index
    %c0_0 = arith.constant 0 : index
    %c0_1 = arith.constant 0 : index
    %0 = vector.load %arg2[%c0, %c0_0, %c0_1] : memref<1x8x64xf32, #tpu.memory_space<vmem>>, vector<1x8x64xf32>
    %1 = vector.shape_cast %0 : vector<1x8x64xf32> to vector<8x64xf32>
    %c0_2 = arith.constant 0 : index
    %c0_3 = arith.constant 0 : index
    %c0_4 = arith.constant 0 : index
    %2 = vector.load %arg3[%c0_2, %c0_3, %c0_4] : memref<1x8x64xf32, #tpu.memory_space<vmem>>, vector<1x8x64xf32>
    %3 = vector.shape_cast %2 : vector<1x8x64xf32> to vector<8x64xf32>
    %4 = tpu.concatenate %1, %3 in 0 : vector<8x64xf32>, vector<8x64xf32> -> vector<16x64xf32>
    %5 = vector.extract_strided_slice %4 {offsets = [0, 0], sizes = [8, 64], strides = [1, 1]} : vector<16x64xf32> to vector<8x64xf32>
    %6 = vector.extract_strided_slice %4 {offsets = [1, 0], sizes = [8, 64], strides = [1, 1]} : vector<16x64xf32> to vector<8x64xf32>
    %7 = tpu.concatenate %5, %6 in 1 : vector<8x64xf32>, vector<8x64xf32> -> vector<8x128xf32>
    %8 = arith.truncf %7 : vector<8x128xf32> to vector<8x128xbf16>
    %c0_5 = arith.constant 0 : index
    %c0_6 = arith.constant 0 : index
    %9 = vector.load %arg4[%c0_5, %c0_6] : memref<128x256xbf16, #tpu.memory_space<vmem>>, vector<128x256xbf16>
    %cst = arith.constant dense<0.000000e+00> : vector<8x256xf32>
    %10 = tpu.matmul %8, %9, %cst {dimension_numbers = #tpu.dot_dimension_numbers<[1], [0], [0], [1], [0, 0, 1, 1], [], []>} : vector<8x128xbf16>, vector<128x256xbf16>, vector<8x256xf32> -> vector<8x256xf32>
    %11 = vector.extract_strided_slice %10 {offsets = [0, 0], sizes = [8, 128], strides = [1, 1]} : vector<8x256xf32> to vector<8x128xf32>
    %12 = vector.extract_strided_slice %10 {offsets = [0, 128], sizes = [8, 128], strides = [1, 1]} : vector<8x256xf32> to vector<8x128xf32>
    %13 = arith.mulf %11, %11 : vector<8x128xf32>
    %14 = arith.mulf %12, %12 : vector<8x128xf32>
    %15 = arith.addf %13, %14 : vector<8x128xf32>
    %c0_7 = arith.constant 0 : index
    %c0_8 = arith.constant 0 : index
    %16 = vector.load %arg5[%c0_7, %c0_8] : memref<128x32xf32, #tpu.memory_space<vmem>>, vector<128x32xf32>
    %cst_9 = arith.constant dense<0.000000e+00> : vector<8x32xf32>
    %17 = tpu.matmul %15, %16, %cst_9 {dimension_numbers = #tpu.dot_dimension_numbers<[1], [0], [0], [1], [0, 0, 1, 1], [], []>} : vector<8x128xf32>, vector<128x32xf32>, vector<8x32xf32> -> vector<8x32xf32>
    %cst_10 = arith.constant 1.000000e-03 : f32
    %18 = vector.broadcast %cst_10 : f32 to vector<8x32xf32>
    %19 = arith.addf %17, %18 : vector<8x32xf32>
    %20 = math.log %19 : vector<8x32xf32>
    %c0_11 = arith.constant 0 : index
    %c0_12 = arith.constant 0 : index
    %c0_13 = arith.constant 0 : index
    %21 = vector.load %arg6[%c0_11, %c0_12, %c0_13] : memref<1x8x32xf32, #tpu.memory_space<vmem>>, vector<1x8x32xf32>
    %22 = vector.shape_cast %21 : vector<1x8x32xf32> to vector<8x32xf32>
    %23 = vector.shape_cast %20 : vector<8x32xf32> to vector<1x8x32xf32>
    tpu.vector_store %arg6[%c0_11, %c0_12, %c0_13], %23 {strides = array<i32>} : memref<1x8x32xf32, #tpu.memory_space<vmem>>, vector<1x8x32xf32>,
    return
  }
  func.func @transform_0(%arg0: i32, %arg1: i32) -> (i32, i32, i32) {
    %c0_i32 = arith.constant 0 : i32
    %c0_i32_0 = arith.constant 0 : i32
    return %arg0, %arg1, %c0_i32 : i32, i32, i32
  }
  func.func @transform_1(%arg0: i32, %arg1: i32) -> (i32, i32, i32) {
    %c1_i32 = arith.constant 1 : i32
    %0 = arith.addi %arg1, %c1_i32 : i32
    %c1_i32_0 = arith.constant 1 : i32
    %1 = arith.muli %0, %c1_i32_0 : i32
    %c0_i32 = arith.constant 0 : i32
    %c0_i32_1 = arith.constant 0 : i32
    return %arg0, %1, %c0_i32 : i32, i32, i32
  }
  func.func @transform_2(%arg0: i32, %arg1: i32) -> (i32, i32) {
    %c0_i32 = arith.constant 0 : i32
    %c0_i32_0 = arith.constant 0 : i32
    %c0_i32_1 = arith.constant 0 : i32
    return %c0_i32, %c0_i32_0 : i32, i32
  }
  func.func @transform_3(%arg0: i32, %arg1: i32) -> (i32, i32) {
    %c0_i32 = arith.constant 0 : i32
    %c0_i32_0 = arith.constant 0 : i32
    %c0_i32_1 = arith.constant 0 : i32
    return %c0_i32, %c0_i32_0 : i32, i32
  }
  func.func @transform_4(%arg0: i32, %arg1: i32) -> (i32, i32, i32) {
    %c0_i32 = arith.constant 0 : i32
    %c0_i32_0 = arith.constant 0 : i32
    return %arg0, %arg1, %c0_i32 : i32, i32, i32
  }
}

</mosaic_0001>

<bundles_post_ra>
// kernel: tpu_custom_call.1
= control target key start
LH: loop header
LB: loop body
LE: loop exit
PB: predicated region body
PF: predicated region fallthrough
CT: control target
= control target key end

     0   :  { %9 = vsyncpa [#allocation3], 0  ;;  %s1264_s0 = inlined_call_operand.vmem [shape: f32[2,16,64], index: 0, kind: input, shape index: {}]   ;;  %s1265_s1 = inlined_call_operand.hbm [shape: f32[2,16,64], index: 1, kind: input, shape index: {}]   ;;  %s1266_s2 = inlined_call_operand.vmem [shape: bf16[128,256], index: 2, kind: input, shape index: {}]   ;;  %s1267_s3 = inlined_call_operand.vmem [shape: f32[128,32], index: 3, kind: input, shape index: {}]   ;;  %s1268_s4 = inlined_call_operand.hbm [shape: f32[2,8,32], index: 4, kind: output, shape index: {}]  }
   0x1   :  { %11 = vsyncpa [#allocation3 + $0x1], 0 }
   0x2   :  { %12 = vsyncpa [#allocation4], 0 }
   0x3   :  { %14 = vsyncpa [#allocation4 + $0x1], 0  ;;  %s976_s15 = smov 0   ;;  %s978_s16 = smov 0  }
   0x4   :  { %s980_s17 = smov 0   ;;  %s982_s18 = smov 0  }
   0x5   :  { %s984_s19 = smov 0   ;;  %s986_s20 = smov 0  }
   0x6 LB: > { %s626_s21 = sadd.s32 4294967295, %s942_s20   ;;  %s627_s22 = sadd.s32 4294967294, %s942_s20   ;;  %s942_s20 = sphi %s986_s20, %s20_s20   ;;  %s938_s19 = sphi %s984_s19, %s1284_s19   ;;  %s934_s18 = sphi %s982_s18, %s1283_s18   ;;  %s930_s17 = sphi %s980_s17, %s1282_s17   ;;  %s926_s16 = sphi %s978_s16, %s1281_s16   ;;  %s922_s15 = sphi %s976_s15, %s1280_s15  }
   0x7   : > { %s32_s23 = sadd.s32 1, %s938_s19  ;;  %s71_s24 = sadd.s32 1, %s930_s17 }
   0x8   : > { %p34_p0 = scmp.ge.s32.totalorder %s32_s23, 2  ;;  %p78_p1 = scmp.ne.s32.totalorder %s930_s17, %s926_s16 }
   0x9   : > { %p79_p2 = scmp.eq.s32.totalorder %s942_s20, 0  ;;  %p84_p3 = scmp.ne.s32.totalorder %s926_s16, %s922_s15 }
   0xa   : > { %s1286_s23 = smov (%p34_p0, %s32_s23), 0  ;;  %p85_p5 = scmp.eq.s32.totalorder %s626_s21, 0 }
   0xb   : > { %p1017_p4 = por %p79_p2, %p78_p1  ;;  %s66_s26 = ssub.s32 %s938_s19, %s1286_s23 }
   0xc   : > { %p152_p6 = scmp.eq.s32.totalorder %s626_s21, 1  ;;  %p69_p7 = scmp.eq.s32.totalorder %s66_s26, 0 }
   0xd   : > { %p1023_p8 = por %p85_p5, %p84_p3  ;;  %p158_p10 = scmp.eq.s32.totalorder %s627_s22, 1 }
   0xe   : > { %p1027_p9 = por %p152_p6, %p78_p1  ;;  %p748_p13 = scmp.lt.s32.totalorder %s942_s20, 2 }
   0xf   : > { %s1032_s29 = scalar_select %p69_p7, %s930_s17, %s71_s24  }
  0x10   : > { %s1272_s28 = scalar_select %p1027_p9, 1, 0 }
  0x11   : > { %p1034_p11 = por %p158_p10, %p84_p3  ;;  %s195_s5 = sand.u32 1, %s930_s17  }
  0x12   : > { %s630_s6 = sshll.u32 %s195_s5, 3  ;;  %s658_s7 = sshll.u32 %s938_s19, 8 }
  0x13   : > { %s1273_s30 = scalar_select %p1034_p11, 1, 0 }
  0x14   : > { %s560_s10 = scalar_lea.hbm %s1265_s1, %s658_s7  ;;  %s199_s11 = scalar_lea.vmem [#allocation2], %s630_s6 }
  0x15   : > { %s209_s12 = sshll.u32 %s199_s11, 4  ;;  %s1045_s13 = scalar_lea.hbm %s560_s10, 128  ;;  %s1047_s12 = int_to_ptr.vmem [resolvable:$true] %s209_s12 }
  0x16   : > { %p1051_p0 = pnand %p748_p13, %p1017_p4  ;;  %s196_s21 = scalar_lea.sflag [#allocation3], %s195_s5 }
  0x17   : > { %s859_s22 = scalar_lea.hbm %s560_s10, 256  ;;  %s834_s25 = scalar_lea.hbm %s1265_s1, 512 }
  0x18   : > { %p830_p3 = scmp.ne.s32.totalorder %s1045_s13, %s859_s22  ;;  %p831_p5 = pneg %p1051_p0 }
  0x19   : > { %p835_p4 = scmp.lt.u32.totalorder %s1045_s13, %s1265_s1  ;;  %p836_p10 = scmp.lt.u32.totalorder %s834_s25, %s859_s22 }
  0x1a   : > { %p832_p6 = pnand %p831_p5, %p830_p3  ;;  %p838_p12 = scmp.lt.u32.totalorder %s859_s22, %s1045_s13 }
  0x1b   : > { %p837_p13 = por %p836_p10, %p835_p4 }
  0x1c   : > { %p833_p7 = pneg %p832_p6 }
  0x1d   : > { %p839_p1 = por %p838_p12, %p837_p13 }
  0x1f   : > { %p840_p2 = pnand %p839_p1, %p833_p7 }
  0x21   : > { %843 = shalt.err (!%p840_p2)
}
  0x22   : > { %s844_s5 = scalar_lea.vmem %s1047_s12, 128  ;;  %s944_s8 = smov [#allocation2]  }
  0x23   : > { %p845_p3 = scmp.ne.s32.totalorder %s1047_s12, %s844_s5  ;;  %s849_s9 = sshll.u32 %s944_s8, 4  ;;  %s850_s9 = int_to_ptr.vmem [resolvable:$false] %s849_s9 }
  0x24   : > { %s851_s10 = scalar_lea.vmem %s850_s9, 256  ;;  %p852_p9 = scmp.lt.s32.totalorder %s1047_s12, %s850_s9 }
  0x25   : > { %p847_p6 = pnand %p845_p3, %p831_p5  ;;  %p853_p4 = scmp.lt.s32.totalorder %s851_s10, %s844_s5 }
  0x27   : > { %p848_p11 = pneg %p847_p6  ;;  %p854_p10 = por %p853_p4, %p852_p9 }
  0x29   : > { %p855_p12 = pnand %p854_p10, %p848_p11 }
  0x2b   : > { %858 = shalt.err (!%p855_p12)
}
  0x2c   : > { %743 = dma.hbm_to_vmem [thread:$0]  (!%p1051_p0), %s1045_s13, 128, %s1047_s12, %s196_s21  }
  0x2d   : > { %p1275_p1 = scmp.lt.s32.totalorder %s942_s20, 3  ;;  %p1276_p2 = scmp.ge.s32.totalorder %s942_s20, 1 }
  0x2f   : > { %p215_p5 = pnand %p1276_p2, %p1275_p1 }
  0x30   : > { %s1086_s11 = sand.u32 (!%p215_p5), 1, %s926_s16  }
  0x31   : > { %218 = sbr.rel (%p215_p5) target bundleno = 643 (0x283), region = 36  ;;  %s634_s22 = sshll.u32 (!%p215_p5), %s1086_s11, 3 }
  0x32   : > { %s221_s24 = scalar_lea.sflag (!%p215_p5), [#allocation3], %s1086_s11  ;;  %s224_s14 = scalar_lea.vmem (!%p215_p5), [#allocation2], %s634_s22 }
  0x38   : > { %913 = dma.done.wait (%p1023_p8), %s221_s24, 128  }
  0x39   : > { %915 = vsyncadd (%p1023_p8), %s221_s24, 4294967168  ;;  %p257_p9 = scmp.lt.s32.totalorder %s934_s18, 1  ;;  %v945_v0 = vmov 0   ;;  %v946_v1 = vmov 0.0|0.0   ;;  %v268_v3 = vld [vmem:[%s224_s14] sm:$0xff]  ;;  %vm271_vm0 = vcmask 1046528  }
  0x3a   : > { %409 = vmatprep.mubr.bf16.mxu0 %v945_v0  ;;  %712 = vmatprep.subr.bf16.mxu1 %v946_v1  ;;  %v273_v5 = vrot.slane %v268_v3, 1  ;;  %v803_v6 = vld [vmem:[%s1266_s2 + $0x4] ss:$8 sps:$4 sm:$0xff]   ;;  %v805_v7 = vld [vmem:[%s1266_s2] ss:$8 sps:$4 sm:$0xff]   ;;  %s947_s10 = smov 64  }
  0x3b   : > { %s258_s12 = scalar_select %p257_p9, %s934_s18, 1  ;;  %v806_v8 = vld [vmem:[%s1266_s2 + $0x14] ss:$8 sps:$4 sm:$0xff]   ;;  %377 = vmatprep.subr.bf16.mxu0 %v803_v6  ;;  %v808_v10 = vld [vmem:[%s1266_s2 + $0x10] ss:$8 sps:$4 sm:$0xff]   ;;  %v421_v14 = vld [vmem:[%s1267_s3] sm:$0xff] }
  0x3c   : > { %378 = vmatpush1.bf16.msra.mxu0 %v805_v7  ;;  %v809_v11 = vld [vmem:[%s1266_s2 + $0x24] ss:$8 sps:$4 sm:$0xff]   ;;  %v811_v12 = vld [vmem:[%s1266_s2 + $0x20] ss:$8 sps:$4 sm:$0xff]   ;;  %v812_v13 = vld [vmem:[%s1266_s2 + $0x34] ss:$8 sps:$4 sm:$0xff]  }
  0x3d   : > { %s659_s13 = sshll.u32 %s258_s12, 4  ;;  %379 = vmatprep.subr.bf16.mxu0 %v806_v8  ;;  %v422_v15 = vld [vmem:[%s1267_s3 + $0x8] sm:$0xff]  ;;  %v814_v16 = vld [vmem:[%s1266_s2 + $0x30] ss:$8 sps:$4 sm:$0xff]   ;;  %v425_v22 = vld [vmem:[%s1267_s3 + $0x20] sm:$0xff]  ;;  %vm278_vm1 = vcmask 523264  }
  0x3e   : > { %s264_s25 = scalar_lea.vmem %s1264_s0, %s659_s13  ;;  %v713_v17 = vpack.c.bf16 %v422_v15, %v421_v14  ;;  %v423_v18 = vld [vmem:[%s1267_s3 + $0x10] sm:$0xff]  ;;  %v424_v19 = vld [vmem:[%s1267_s3 + $0x18] sm:$0xff]  ;;  %v815_v20 = vld [vmem:[%s1266_s2 + $0x44] ss:$8 sps:$4 sm:$0xff]   ;;  %vm948_vm2 = vmmov 0   ;;  %v949_v50 = vmov 0.0  }
  0x3f   : > { %v1102_v2 = vld [vmem:[%s264_s25] sm:$0xff]  ;;  %v716_v21 = vpack.c.bf16 %v424_v19, %v423_v18  ;;  %v426_v23 = vld [vmem:[%s1267_s3 + $0x28] sm:$0xff]  ;;  %v818_v25 = vld [vmem:[%s1266_s2 + $0x54] ss:$8 sps:$4 sm:$0xff]   ;;  %709 = vmatprep.mubr.msk.f32.mxu1 %vm948_vm2, %v949_v50  ;;  %s655_s12 = sshll.u32 %s934_s18, 7  ;;  %s256_s13 = scalar_lea.vmem [#allocation5], %s634_s22 }
  0x40   : > { %v272_v4 = vrot.slane %v1102_v2, 1  ;;  %380 = vmatpush1.bf16.msra.mxu0 %v808_v10  ;;  %714 = vmatpush3.bf16.msra.mxu1 %v713_v17  ;;  %v817_v24 = vld [vmem:[%s1266_s2 + $0x40] ss:$8 sps:$4 sm:$0xff]   ;;  %v719_v26 = vpack.c.bf16 %v426_v23, %v425_v22  ;;  %v427_v27 = vld [vmem:[%s1267_s3 + $0x30] sm:$0xff]  ;;  %v428_v28 = vld [vmem:[%s1267_s3 + $0x38] sm:$0xff]  ;;  %s526_s21 = sshll.u32 %s256_s13, 4  ;;  %s1215_s27 = scalar_lea.hbm %s1268_s4, %s655_s12  ;;  %s1217_s21 = int_to_ptr.vmem [resolvable:$true] %s526_s21 }
  0x41   : > { %381 = vmatprep.subr.bf16.mxu0 %v809_v11  ;;  %715 = vmatprep.subr.bf16.mxu1 %v946_v1  ;;  %v820_v29 = vld [vmem:[%s1266_s2 + $0x50] ss:$8 sps:$4 sm:$0xff]   ;;  %v821_v30 = vld [vmem:[%s1266_s2 + $0x64] ss:$8 sps:$4 sm:$0xff]   ;;  %v722_v31 = vpack.c.bf16 %v428_v28, %v427_v27  ;;  %v823_v34 = vld [vmem:[%s1266_s2 + $0x60] ss:$8 sps:$4 sm:$0xff]  }
  0x42   : > { %v274_v9 = vsel %vm271_vm0, %v272_v4, %v273_v5  ;;  %v429_v32 = vld [vmem:[%s1267_s3 + $0x40] sm:$0xff]  ;;  %v430_v33 = vld [vmem:[%s1267_s3 + $0x48] sm:$0xff]  ;;  %v824_v35 = vld [vmem:[%s1266_s2 + $0x74] ss:$8 sps:$4 sm:$0xff]   ;;  %vm509_vm3 = vcmask 261120   ;;  %s512_s6 = scalar_lea.sflag [#allocation4], %s1086_s11 }
  0x43   : > { %275 = vrot.lane.b32.xlu0 %v274_v9, %s947_s10  ;;  %v725_v36 = vpack.c.bf16 %v430_v33, %v429_v32  ;;  %v431_v37 = vld [vmem:[%s1267_s3 + $0x50] sm:$0xff]  ;;  %v432_v38 = vld [vmem:[%s1267_s3 + $0x58] sm:$0xff]  ;;  %v433_v41 = vld [vmem:[%s1267_s3 + $0x60] sm:$0xff]  ;;  %s860_s7 = scalar_lea.vmem %s1217_s21, 128  ;;  %p1277_p11 = scmp.ne.s32.totalorder %s1272_s28, 0 }
  0x44   : > { %382 = vmatpush1.bf16.msra.mxu0 %v811_v12  ;;  %717 = vmatpush3.bf16.msra.mxu1 %v716_v21  ;;  %v826_v39 = vld [vmem:[%s1266_s2 + $0x70] ss:$8 sps:$4 sm:$0xff]   ;;  %v728_v40 = vpack.c.bf16 %v432_v38, %v431_v37  ;;  %v434_v42 = vld [vmem:[%s1267_s3 + $0x68] sm:$0xff]  ;;  %p861_p8 = scmp.ne.s32.totalorder %s1217_s21, %s860_s7  ;;  %s950_s18 = smov [#allocation5]  }
  0x45   : > { %383 = vmatprep.subr.bf16.mxu0 %v812_v13  ;;  %718 = vmatprep.subr.bf16.mxu1 %v946_v1  ;;  %v731_v43 = vpack.c.bf16 %v434_v42, %v433_v41  ;;  %v435_v47 = vld [vmem:[%s1267_s3 + $0x70] sm:$0xff]  ;;  %v436_v48 = vld [vmem:[%s1267_s3 + $0x78] sm:$0xff]  ;;  %s864_s22 = sshll.u32 %s950_s18, 4  ;;  %s865_s22 = int_to_ptr.vmem [resolvable:$false] %s864_s22 }
  0x46   : > { %v734_v49 = vpack.c.bf16 %v436_v48, %v435_v47  ;;  %p862_p0 = pnand %p861_p8, %p1277_p11  ;;  %s866_s5 = scalar_lea.vmem %s865_s22, 256 }
  0x47   : > { %p867_p13 = scmp.lt.s32.totalorder %s1217_s21, %s865_s22  ;;  %p868_p3 = scmp.lt.s32.totalorder %s866_s5, %s860_s7 }
  0x48   : > { %384 = vmatpush1.bf16.msra.mxu0 %v814_v16  ;;  %720 = vmatpush3.bf16.msra.mxu1 %v719_v26  ;;  %p863_p7 = pneg %p862_p0 }
  0x49   : > { %385 = vmatprep.subr.bf16.mxu0 %v815_v20  ;;  %721 = vmatprep.subr.bf16.mxu1 %v946_v1  ;;  %p869_p6 = por %p868_p3, %p867_p13 }
  0x4b   : > { %p870_p4 = pnand %p869_p6, %p863_p7 }
  0x4c   : > { %386 = vmatpush1.bf16.msra.mxu0 %v817_v24  ;;  %723 = vmatpush3.bf16.msra.mxu1 %v722_v31 }
  0x4d   : > { %387 = vmatprep.subr.bf16.mxu0 %v818_v25  ;;  %724 = vmatprep.subr.bf16.mxu1 %v946_v1 }
  0x50   : > { %388 = vmatpush1.bf16.msra.mxu0 %v820_v29  ;;  %726 = vmatpush3.bf16.msra.mxu1 %v725_v36 }
  0x51   : > { %389 = vmatprep.subr.bf16.mxu0 %v821_v30  ;;  %727 = vmatprep.subr.bf16.mxu1 %v946_v1 }
  0x54   : > { %390 = vmatpush1.bf16.msra.mxu0 %v823_v34  ;;  %729 = vmatpush3.bf16.msra.mxu1 %v728_v40 }
  0x55   : > { %391 = vmatprep.subr.bf16.mxu0 %v824_v35  ;;  %730 = vmatprep.subr.bf16.mxu1 %v946_v1 }
  0x58   : > { %392 = vmatpush1.bf16.msra.mxu0 %v826_v39  ;;  %732 = vmatpush3.bf16.msra.mxu1 %v731_v43 }
  0x59   : > { %733 = vmatprep.subr.bf16.mxu1 %v946_v1 }
  0x5c   : > { %735 = vmatpush3.bf16.msra.mxu1 %v734_v49 }
  0xb5   : > { %v276_v44 = vpop.permute.xlu0 %275 }
  0xb6   : > { %v279_v45 = vsel %vm278_vm1, %v1102_v2, %v276_v44 }
  0xb7   : > { %v280_v46 = vpack.c.bf16 %v279_v45, %v279_v45 }
  0xb9   : > { %410 = vmatmul.mubr.bf16.vlgmr.msra.gmra.mrb[0].mxu0 %v280_v46 }
 0x18c   : > { %v411_v51 = vpop.f32.mrb[0].mxu0 }
 0x18d   : > { %v418_v52 = vmul.f32 %v411_v51, %v411_v51  ;;  %v413_v53 = vpop.f32.mrb[1].mxu0 }
 0x18e   : > { %v419_v54 = vmul.f32 %v413_v53, %v413_v53  ;;  %v415_v55 = vpop.f32.mrb[2].mxu0 }
 0x18f   : > { %v416_v56 = vpop.f32.mrb[3].mxu0 }
 0x190   : > { %v420_v57 = vadd.f32 %v419_v54, %v418_v52 }
 0x192   : > { %710 = vmatmul.mubr.f32.vlgmr.msra.gmra.mrb[0].mxu1 %v420_v57 }
 0x265   : > { %v503_v58 = vpop.f32.mrb[0].mxu1 }
 0x266   : > { %v504_v59 = vadd.f32 0.001, %v503_v58  ;;  %v711_v60 = vpop.f32.mrb[1].mxu1 }
 0x268   : > { %827 = vlog2.f32 %v504_v59 }
 0x272   : > { %v828_v61 = vpop.eup %827 }
 0x273   : > { %v508_v62 = vmul.f32 0.6931472, %v828_v61 }
 0x275   : > { %510 = vst.msk [vmem:[%s256_s13] sm:$0xff] %vm509_vm3, %v508_v62 }
 0x276   : > { %873 = shalt.err (!%p870_p4)
}
 0x277   : > { %s874_s11 = scalar_lea.hbm %s1215_s27, 128  ;;  %s878_s10 = scalar_lea.hbm %s1268_s4, 256 }
 0x278   : > { %p875_p10 = scmp.ne.s32.totalorder %s1215_s27, %s874_s11  ;;  %p879_p2 = scmp.lt.u32.totalorder %s1215_s27, %s1268_s4 }
 0x279   : > { %p880_p5 = scmp.lt.u32.totalorder %s878_s10, %s874_s11  ;;  %p882_p8 = scmp.lt.u32.totalorder %s874_s11, %s1215_s27 }
 0x27a   : > { %p876_p12 = pnand %p875_p10, %p1277_p11 }
 0x27b   : > { %p881_p9 = por %p880_p5, %p879_p2 }
 0x27c   : > { %p877_p1 = pneg %p876_p12 }
 0x27d   : > { %p883_p0 = por %p882_p8, %p881_p9 }
 0x27f   : > { %p884_p7 = pnand %p883_p0, %p877_p1 }
 0x281   : > { %887 = shalt.err (!%p884_p7)
}
 0x282   : > { %738 = dma.vmem_to_hbm [thread:$0]  (%p1277_p11), %s1217_s21, 128, %s1215_s27, %s512_s6  }
 0x283 PF: > { %s538_s12 = sand.u32 1, %s922_s15   ;;  %p1278_p13 = scmp.ne.s32.totalorder %s1273_s30, 0 }
 0x284   : > { %p1279_p3 = scmp.ge.s32.totalorder %s942_s20, 2  ;;  %s539_s13 = scalar_lea.sflag [#allocation4], %s538_s12 }
 0x286   : > { %p745_p6 = pnand %p1279_p3, %p1278_p13 }
 0x288   : > { %917 = dma.done.wait (!%p745_p6), %s539_s13, 128  }
 0x289   : > { %919 = vsyncadd (!%p745_p6), %s539_s13, 4294967168  ;;  %s20_s20 = sadd.s32 1, %s942_s20   ;;  %s1280_s15 = smov %s926_s16 }
 0x28a   : > { %p17_p4 = scmp.ge.s32.totalorder %s20_s20, 4   ;;  %s1281_s16 = smov %s930_s17 }
 0x28b   : > { %s1282_s17 = smov %s1032_s29  ;;  %s1283_s18 = smov %s938_s19 }
 0x28c   : > { %s1284_s19 = smov %s1286_s23  ;;  %19 = sbr.rel (!%p17_p4) target bundleno = 6 (0x6), region = 84 }
 0x293   :  { %544 = vsyncpa [#allocation3], 1 }
 0x294   :  { %546 = vsyncpa [#allocation3 + $0x1], 1 }
 0x295   :  { %547 = vsyncpa [#allocation4], 1 }
 0x296   :  { %549 = vsyncpa [#allocation4 + $0x1], 1 }

</bundles_post_ra>
